<compile_context>
chip_gen: v7x
topology: tpu7x:2x2x1
jax: 0.10.0
libtpu: 0.0.40
codegen_flags: <defaults>
</compile_context>

<pallas_src>
import math
import functools

import jax
import jax.numpy as jnp
from jax import lax
from jax.experimental import pallas as pl
from jax.experimental.pallas import tpu as pltpu


# ---------------------------------------------------------------------------
# small math helpers
# ---------------------------------------------------------------------------
def _layer_norm(x, w, b, eps=1e-5):
    mu = jnp.mean(x, axis=-1, keepdims=True)
    var = jnp.mean((x - mu) ** 2, axis=-1, keepdims=True)
    return (x - mu) * lax.rsqrt(var + eps) * w + b


def _erf_poly(x):
    # Abramowitz & Stegun 7.1.26 rational approximation, max abs error ~1.5e-7.
    # Uses only exp (EUP) + VPU polynomial -> safe to lower inside Mosaic.
    sgn = jnp.where(x < 0.0, -1.0, 1.0)
    ax = jnp.abs(x)
    t = 1.0 / (1.0 + 0.3275911 * ax)
    poly = t * (0.254829592 + t * (-0.284496736 + t * (1.421413741
                + t * (-1.453152027 + t * 1.061405429))))
    return sgn * (1.0 - poly * jnp.exp(-(ax * ax)))


def _gelu(x):
    # matches torch.nn.GELU() (exact, erf-based) to ~1e-7
    return 0.5 * x * (1.0 + _erf_poly(x * 0.7071067811865476))


# ---------------------------------------------------------------------------
# Pallas kernel: full TransformerBlock stack; grid = (batch, layer)
# ---------------------------------------------------------------------------
def transformer_stack_kernel(mask_col_ref, mask_row_ref, x_ref,
                             ln1w_ref, ln1b_ref, wqkv_ref, wo_ref,
                             ln2w_ref, ln2b_ref, w1_ref, b1_ref, w2_ref, b2_ref,
                             out_ref, attn_ref, *, num_heads):
    layer = pl.program_id(1)

    # Layer 0: seed the carried activation (resident output block) from the input.
    @pl.when(layer == 0)
    def _():
        out_ref[...] = x_ref[...]

    x = out_ref[0]                         # [S, D] f32, carried across layers
    mcol = mask_col_ref[0]                 # [S, 1] f32, exact 0/1
    mrow = mask_row_ref[0]                 # [1, S] f32, exact 0/1
    S, D = x.shape
    dk = D // num_heads

    # Additive key-mask bias ([1,S]) replaces the old [S,S] mask + two selects.
    # Masked key columns get -1e9; after subtract-max, exp underflows to exact 0.
    kbias = (mrow - 1.0) * 1e9

    # ---------------- attention sublayer (pre-LN -> MHA -> residual) --------
    xn = _layer_norm(x, ln1w_ref[0], ln1b_ref[0])
    # fused QKV projection; 1/sqrt(dk) is pre-folded into the Q weight columns
    qkv = jnp.dot(xn.astype(jnp.bfloat16), wqkv_ref[0],
                  preferred_element_type=jnp.float32)            # [S, 3D] f32
    q = qkv[:, :D].astype(jnp.bfloat16)
    k = qkv[:, D:2 * D].astype(jnp.bfloat16)
    v = qkv[:, 2 * D:].astype(jnp.bfloat16)

    for h in range(num_heads):             # static loop; num_heads is small
        sl = slice(h * dk, (h + 1) * dk)
        scores = lax.dot_general(q[:, sl], k[:, sl],
                                 (((1,), (1,)), ((), ())),
                                 preferred_element_type=jnp.float32)   # [S, S]
        scores = scores + kbias
        m = jnp.max(scores, axis=-1, keepdims=True)
        e = jnp.exp(scores - m)
        p = e * pl.reciprocal(jnp.sum(e, axis=-1, keepdims=True), approx=True)
        # per-head slice write into the [S, D] scratch (no concatenate relayout)
        attn_ref[:, sl] = jnp.dot(p.astype(jnp.bfloat16), v[:, sl],
                                  preferred_element_type=jnp.float32)  # [S, dk]

    # Zero fully-masked query rows ONCE (replaces per-head p-zeroing), then Wo.
    attn = (attn_ref[...] * mcol).astype(jnp.bfloat16)                 # [S, D]
    x = x + jnp.dot(attn, wo_ref[0], preferred_element_type=jnp.float32)

    # ---------------- feed-forward sublayer (pre-LN -> FFN -> residual) -----
    xn2 = _layer_norm(x, ln2w_ref[0], ln2b_ref[0])
    h1 = _gelu(jnp.dot(xn2.astype(jnp.bfloat16), w1_ref[0],
                       preferred_element_type=jnp.float32) + b1_ref[0])
    ff = jnp.dot(h1.astype(jnp.bfloat16), w2_ref[0],
                 preferred_element_type=jnp.float32) + b2_ref[0]
    # PositionwiseFeedForward row masking: rows with mask.sum(-1)==0 are zeroed,
    # which for binary padding masks is exactly the rows where mcol == 0.
    ff = jnp.where(mcol > 0.0, ff, 0.0)

    out_ref[0] = x + ff
    # TODO(synk): dropout layers are identity (eval mode); attention-map caching
    # and register_hook gradient saving are not produced by the kernel.


# ---------------------------------------------------------------------------
# BlockSpecs, VMEM budget, pallas_call wrapper
# ---------------------------------------------------------------------------
def _layer_specs(S, D):
    dff = 4 * D

    def wspec(shape):   # per-layer weight, indexed by the layer grid axis
        zeros = (0,) * len(shape)
        return pl.BlockSpec((1,) + shape, lambda b, l, _z=zeros: (l,) + _z)

    def bspec(shape):   # per-batch activation / mask, constant across the layer axis
        zeros = (0,) * len(shape)
        return pl.BlockSpec((1,) + shape, lambda b, l, _z=zeros: (b,) + _z)

    in_specs = [
        bspec((S, 1)),                        # mask column  [B, S, 1]
        bspec((1, S)),                        # mask row     [B, 1, S]
        bspec((S, D)),                        # x            [B, S, D]
        wspec((1, D)), wspec((1, D)),         # ln1 w, b     [L, 1, D]
        wspec((D, 3 * D)),                    # fused Wqkv   [L, D, 3D]  bf16
        wspec((D, D)),                        # Wo           [L, D, D]   bf16
        wspec((1, D)), wspec((1, D)),         # ln2 w, b
        wspec((D, dff)), wspec((1, dff)),     # W1 bf16, b1
        wspec((dff, D)), wspec((1, D)),       # W2 bf16, b2
    ]
    out_specs = bspec((S, D))                 # carried activation / final output
    return in_specs, out_specs


def _vmem_limit_bytes(S, D):
    dff = 4 * D
    weights = 2 * 2 * (3 * D * D + D * D + D * dff + dff * D)   # bf16, double-buffered
    biases = 2 * 4 * (4 * D + dff + D)                          # f32 LN/bias blocks, 2-buf
    acts = 2 * 2 * 4 * S * D                                    # x in + carried out, f32, 2-buf
    temps = 4 * (S * 3 * D + S * dff + 3 * S * S + 2 * S * D)   # qkv/h1/scores/attn f32 temps
    est = weights + biases + acts + temps + (16 << 20)          # + compiler scratch headroom
    try:
        cap = pltpu.get_tpu_info().vmem_capacity_bytes          # 128 MiB v5e/v6e, 64 MiB v7x
    except Exception:
        cap = 64 << 20                                          # conservative fallback
    budget = min(int(cap * 0.8), 100 << 20)                     # chip-aware cap
    return int(min(budget, max(32 << 20, est)))


def prepare_stacked_params(params, num_heads):
    """Stack per-layer weights along a leading layer axis, fuse Q/K/V (with the
    1/sqrt(dk) attention scale folded into the Q columns) and cast matmul weights
    to bf16 (biases / LayerNorm params stay f32)."""
    D = params[0]["wq"].shape[0]
    dk = D // num_heads
    scale = 1.0 / math.sqrt(dk)

    def stk(fn, dtype):
        return jnp.stack([fn(p) for p in params], axis=0).astype(dtype)

    return dict(
        ln1w=stk(lambda p: p["ln1w"], jnp.float32),
        ln1b=stk(lambda p: p["ln1b"], jnp.float32),
        wqkv=stk(lambda p: jnp.concatenate([p["wq"] * scale, p["wk"], p["wv"]],
                                           axis=1), jnp.bfloat16),
        wo=stk(lambda p: p["wo"], jnp.bfloat16),
        ln2w=stk(lambda p: p["ln2w"], jnp.float32),
        ln2b=stk(lambda p: p["ln2b"], jnp.float32),
        w1=stk(lambda p: p["w1"], jnp.bfloat16),
        b1=stk(lambda p: p["b1"], jnp.float32),
        w2=stk(lambda p: p["w2"], jnp.bfloat16),
        b2=stk(lambda p: p["b2"], jnp.float32),
    )


def transformer_layer_pallas(x, mask, params, num_heads):
    """pyhealth TransformerLayer.forward (stack of TransformerBlocks), eval mode.

    x: [B,S,D] f32; mask: [B,S] (1 valid / 0 pad, binary) or None.
    Returns (emb [B,S,D], cls_emb [B,D]).
    """
    B, S, D = x.shape
    if mask is None:
        mask = jnp.ones((B, S), jnp.float32)
    mask = mask.astype(jnp.float32)
    mask_col = mask.reshape(B, S, 1)      # no [B,S,S] pairwise mask is materialized
    mask_row = mask.reshape(B, 1, S)

    stk = prepare_stacked_params(params, num_heads)
    L = stk["wqkv"].shape[0]
    in_specs, out_specs = _layer_specs(S, D)
    kernel = functools.partial(transformer_stack_kernel, num_heads=num_heads)

    emb = pl.pallas_call(
        kernel,
        out_shape=jax.ShapeDtypeStruct((B, S, D), jnp.float32),
        grid_spec=pltpu.PrefetchScalarGridSpec(
            num_scalar_prefetch=0,
            grid=(B, L),                                   # layer axis innermost
            in_specs=in_specs,
            out_specs=out_specs,
            scratch_shapes=[pltpu.VMEM((S, D), jnp.float32)],   # per-head output slab
        ),
        compiler_params=pltpu.CompilerParams(
            dimension_semantics=("parallel", "arbitrary"),
            vmem_limit_bytes=_vmem_limit_bytes(S, D)),
    )(mask_col, mask_row, x,
      stk["ln1w"], stk["ln1b"], stk["wqkv"], stk["wo"],
      stk["ln2w"], stk["ln2b"], stk["w1"], stk["b1"], stk["w2"], stk["b2"])

    return emb, emb[:, 0, :]


# ---------------------------------------------------------------------------
# pure-JAX f32 reference (mirrors the PyTorch module, eval mode)
# ---------------------------------------------------------------------------
def _ref_block(x, mask3, p, H):
    B, S, D = x.shape
    dk = D // H
    xn = _layer_norm(x, p["ln1w"][0], p["ln1b"][0])
    q, k, v = xn @ p["wq"], xn @ p["wk"], xn @ p["wv"]
    split = lambda t: t.reshape(B, S, H, dk).transpose(0, 2, 1, 3)
    q, k, v = split(q), split(k), split(v)
    scores = jnp.einsum("bhqd,bhkd->bhqk", q, k) / math.sqrt(dk)
    m = mask3[:, None]
    scores = jnp.where(m == 0, -1e9, scores)
    pa = jax.nn.softmax(scores, axis=-1)
    pa = jnp.where(m == 0, 0.0, pa)
    o = jnp.einsum("bhqk,bhkd->bhqd", pa, v).transpose(0, 2, 1, 3).reshape(B, S, D)
    x = x + o @ p["wo"]
    xn2 = _layer_norm(x, p["ln2w"][0], p["ln2b"][0])
    ff = jax.nn.gelu(xn2 @ p["w1"] + p["b1"][0], approximate=False) @ p["w2"] + p["b2"][0]
    valid = jnp.sum(mask3, axis=-1, keepdims=True) > 0
    ff = jnp.where(valid, ff, 0.0)
    return x + ff


def _ref_layer(x, mask, params, H):
    mask = mask.astype(jnp.float32)
    mask3 = jnp.einsum("ab,ac->abc", mask, mask)
    for p in params:
        x = _ref_block(x, mask3, p, H)
    return x, x[:, 0, :]


# ---------------------------------------------------------------------------
# deterministic parameter init (shapes from the module's __init__)
# ---------------------------------------------------------------------------
def init_params(key, D, num_layers):
    dff = 4 * D
    params = []
    for layer in range(num_layers):
        ks = jax.random.split(jax.random.fold_in(key, layer), 8)
        scale = 0.05
        params.append(dict(
            ln1w=jnp.ones((1, D), jnp.float32),
            ln1b=jnp.zeros((1, D), jnp.float32),
            wq=scale * jax.random.normal(ks[0], (D, D), jnp.float32),
            wk=scale * jax.random.normal(ks[1], (D, D), jnp.float32),
            wv=scale * jax.random.normal(ks[2], (D, D), jnp.float32),
            wo=scale * jax.random.normal(ks[3], (D, D), jnp.float32),
            ln2w=jnp.ones((1, D), jnp.float32),
            ln2b=jnp.zeros((1, D), jnp.float32),
            w1=scale * jax.random.normal(ks[4], (D, dff), jnp.float32),
            b1=scale * jax.random.normal(ks[5], (1, dff), jnp.float32),
            w2=scale * jax.random.normal(ks[6], (dff, D), jnp.float32),
            b2=scale * jax.random.normal(ks[7], (1, D), jnp.float32),
        ))
    return params


# ---------------------------------------------------------------------------
if __name__ == "__main__":
    B, S, D, HEADS, LAYERS = 2, 8, 32, 2, 2
    key = jax.random.PRNGKey(0)
    kx, kp = jax.random.split(key)

    x = jax.random.normal(kx, (B, S, D), jnp.float32)
    lengths = jnp.array([8, 5], jnp.int32)
    mask = (jnp.arange(S)[None, :] < lengths[:, None]).astype(jnp.float32)  # [B,S]

    params = init_params(kp, D, LAYERS)

    emb, cls_emb = transformer_layer_pallas(x, mask, params, HEADS)
    jax.block_until_ready(emb)
    jax.block_until_ready(cls_emb)

    # correctness check against the pure-JAX f32 reference
    # (tolerance loosened because matmuls run with bf16 operands on the MXU and the
    #  softmax denominator uses pl.reciprocal(approx=True))
    emb_ref, cls_ref = _ref_layer(x, mask, params, HEADS)
    assert emb.shape == (B, S, D) and cls_emb.shape == (B, D)
    assert jnp.allclose(emb, emb_ref, atol=2e-2, rtol=2e-2)
    assert jnp.allclose(cls_emb, cls_ref, atol=2e-2, rtol=2e-2)

    print("KERNEL_OK")
</pallas_src>

<mosaic_0001>
module attributes {stable_mosaic.version = 11 : i64} {
  func.func @transformer_stack_kernel(%arg0: i32, %arg1: i32, %arg2: memref<1x8x1xf32, #tpu.memory_space<vmem>>, %arg3: memref<1x1x8xf32, #tpu.memory_space<vmem>>, %arg4: memref<1x8x32xf32, #tpu.memory_space<vmem>>, %arg5: memref<1x1x32xf32, #tpu.memory_space<vmem>>, %arg6: memref<1x1x32xf32, #tpu.memory_space<vmem>>, %arg7: memref<1x32x96xbf16, #tpu.memory_space<vmem>>, %arg8: memref<1x32x32xbf16, #tpu.memory_space<vmem>>, %arg9: memref<1x1x32xf32, #tpu.memory_space<vmem>>, %arg10: memref<1x1x32xf32, #tpu.memory_space<vmem>>, %arg11: memref<1x32x128xbf16, #tpu.memory_space<vmem>>, %arg12: memref<1x1x128xf32, #tpu.memory_space<vmem>>, %arg13: memref<1x128x32xbf16, #tpu.memory_space<vmem>>, %arg14: memref<1x1x32xf32, #tpu.memory_space<vmem>>, %arg15: memref<1x8x32xf32, #tpu.memory_space<vmem>>, %arg16: memref<8x32xf32, #tpu.memory_space<vmem>>) attributes {dimension_semantics = [#tpu.dimension_semantics<parallel>, #tpu.dimension_semantics<arbitrary>], iteration_bounds = array<i64: 2, 2>, scalar_prefetch = 0 : i64, scratch_operands = 1 : i64, tpu.core_type = #tpu.core_type<tc>, window_params = [{transform_indices = @transform_0, window_bounds = array<i64: 1, 8, 1>}, {transform_indices = @transform_1, window_bounds = array<i64: 1, 1, 8>}, {transform_indices = @transform_2, window_bounds = array<i64: 1, 8, 32>}, {transform_indices = @transform_3, window_bounds = array<i64: 1, 1, 32>}, {transform_indices = @transform_4, window_bounds = array<i64: 1, 1, 32>}, {transform_indices = @transform_5, window_bounds = array<i64: 1, 32, 96>}, {transform_indices = @transform_6, window_bounds = array<i64: 1, 32, 32>}, {transform_indices = @transform_7, window_bounds = array<i64: 1, 1, 32>}, {transform_indices = @transform_8, window_bounds = array<i64: 1, 1, 32>}, {transform_indices = @transform_9, window_bounds = array<i64: 1, 32, 128>}, {transform_indices = @transform_10, window_bounds = array<i64: 1, 1, 128>}, {transform_indices = @transform_11, window_bounds = array<i64: 1, 128, 32>}, {transform_indices = @transform_12, window_bounds = array<i64: 1, 1, 32>}, {transform_indices = @transform_13, window_bounds = array<i64: 1, 8, 32>}]} {
    %c0_i32 = arith.constant 0 : i32
    %0 = arith.cmpi eq, %arg1, %c0_i32 : i32
    %1 = arith.extui %0 : i1 to i32
    %c0_i32_0 = arith.constant 0 : i32
    %2 = arith.cmpi ne, %1, %c0_i32_0 : i32
    scf.if %2 {
      %c0_88 = arith.constant 0 : index
      %c0_89 = arith.constant 0 : index
      %c0_90 = arith.constant 0 : index
      %188 = vector.load %arg4[%c0_88, %c0_89, %c0_90] : memref<1x8x32xf32, #tpu.memory_space<vmem>>, vector<1x8x32xf32>
      %c0_91 = arith.constant 0 : index
      %c0_92 = arith.constant 0 : index
      %c0_93 = arith.constant 0 : index
      %189 = vector.load %arg15[%c0_91, %c0_92, %c0_93] : memref<1x8x32xf32, #tpu.memory_space<vmem>>, vector<1x8x32xf32>
      tpu.vector_store %arg15[%c0_91, %c0_92, %c0_93], %188 {strides = array<i32>} : memref<1x8x32xf32, #tpu.memory_space<vmem>>, vector<1x8x32xf32>,
    } else {
    }
    %c0 = arith.constant 0 : index
    %c0_1 = arith.constant 0 : index
    %c0_2 = arith.constant 0 : index
    %3 = vector.load %arg15[%c0, %c0_1, %c0_2] : memref<1x8x32xf32, #tpu.memory_space<vmem>>, vector<1x8x32xf32>
    %4 = vector.shape_cast %3 : vector<1x8x32xf32> to vector<8x32xf32>
    %c0_3 = arith.constant 0 : index
    %c0_4 = arith.constant 0 : index
    %c0_5 = arith.constant 0 : index
    %5 = vector.load %arg2[%c0_3, %c0_4, %c0_5] : memref<1x8x1xf32, #tpu.memory_space<vmem>>, vector<1x8x1xf32>
    %6 = vector.shape_cast %5 : vector<1x8x1xf32> to vector<8x1xf32>
    %c0_6 = arith.constant 0 : index
    %c0_7 = arith.constant 0 : index
    %c0_8 = arith.constant 0 : index
    %7 = vector.load %arg3[%c0_6, %c0_7, %c0_8] : memref<1x1x8xf32, #tpu.memory_space<vmem>>, vector<1x1x8xf32>
    %8 = vector.shape_cast %7 : vector<1x1x8xf32> to vector<1x8xf32>
    %cst = arith.constant 1.000000e+00 : f32
    %9 = vector.broadcast %cst : f32 to vector<1x8xf32>
    %10 = arith.subf %8, %9 : vector<1x8xf32>
    %cst_9 = arith.constant 1.000000e+09 : f32
    %11 = vector.broadcast %cst_9 : f32 to vector<1x8xf32>
    %12 = arith.mulf %10, %11 : vector<1x8xf32>
    %c0_10 = arith.constant 0 : index
    %c0_11 = arith.constant 0 : index
    %c0_12 = arith.constant 0 : index
    %13 = vector.load %arg5[%c0_10, %c0_11, %c0_12] : memref<1x1x32xf32, #tpu.memory_space<vmem>>, vector<1x1x32xf32>
    %14 = vector.shape_cast %13 : vector<1x1x32xf32> to vector<1x32xf32>
    %c0_13 = arith.constant 0 : index
    %c0_14 = arith.constant 0 : index
    %c0_15 = arith.constant 0 : index
    %15 = vector.load %arg6[%c0_13, %c0_14, %c0_15] : memref<1x1x32xf32, #tpu.memory_space<vmem>>, vector<1x1x32xf32>
    %16 = vector.shape_cast %15 : vector<1x1x32xf32> to vector<1x32xf32>
    %cst_16 = arith.constant dense<0.000000e+00> : vector<8xf32>
    %17 = vector.multi_reduction <add>, %4, %cst_16 [1] : vector<8x32xf32> to vector<8xf32>
    %18 = vector.shape_cast %17 : vector<8xf32> to vector<8x1xf32>
    %cst_17 = arith.constant 3.200000e+01 : f32
    %19 = vector.broadcast %cst_17 : f32 to vector<8x1xf32>
    %20 = arith.divf %18, %19 : vector<8x1xf32>
    %21 = vector.broadcast %20 : vector<8x1xf32> to vector<8x32xf32>
    %22 = arith.subf %4, %21 : vector<8x32xf32>
    %23 = arith.mulf %22, %22 : vector<8x32xf32>
    %cst_18 = arith.constant dense<0.000000e+00> : vector<8xf32>
    %24 = vector.multi_reduction <add>, %23, %cst_18 [1] : vector<8x32xf32> to vector<8xf32>
    %25 = vector.shape_cast %24 : vector<8xf32> to vector<8x1xf32>
    %cst_19 = arith.constant 3.200000e+01 : f32
    %26 = vector.broadcast %cst_19 : f32 to vector<8x1xf32>
    %27 = arith.divf %25, %26 : vector<8x1xf32>
    %28 = vector.broadcast %20 : vector<8x1xf32> to vector<8x32xf32>
    %29 = arith.subf %4, %28 : vector<8x32xf32>
    %cst_20 = arith.constant 9.99999974E-6 : f32
    %30 = vector.broadcast %cst_20 : f32 to vector<8x1xf32>
    %31 = arith.addf %27, %30 : vector<8x1xf32>
    %32 = math.rsqrt %31 : vector<8x1xf32>
    %33 = vector.broadcast %32 : vector<8x1xf32> to vector<8x32xf32>
    %34 = arith.mulf %29, %33 : vector<8x32xf32>
    %35 = vector.broadcast %14 : vector<1x32xf32> to vector<8x32xf32>
    %36 = arith.mulf %34, %35 : vector<8x32xf32>
    %37 = vector.broadcast %16 : vector<1x32xf32> to vector<8x32xf32>
    %38 = arith.addf %36, %37 : vector<8x32xf32>
    %39 = arith.truncf %38 : vector<8x32xf32> to vector<8x32xbf16>
    %c0_21 = arith.constant 0 : index
    %c0_22 = arith.constant 0 : index
    %c0_23 = arith.constant 0 : index
    %40 = vector.load %arg7[%c0_21, %c0_22, %c0_23] : memref<1x32x96xbf16, #tpu.memory_space<vmem>>, vector<1x32x96xbf16>
    %41 = vector.shape_cast %40 : vector<1x32x96xbf16> to vector<32x96xbf16>
    %cst_24 = arith.constant dense<0.000000e+00> : vector<8x96xf32>
    %42 = tpu.matmul %39, %41, %cst_24 {dimension_numbers = #tpu.dot_dimension_numbers<[1], [0], [0], [1], [0, 0, 1, 1], [], []>} : vector<8x32xbf16>, vector<32x96xbf16>, vector<8x96xf32> -> vector<8x96xf32>
    %43 = vector.extract_strided_slice %42 {offsets = [0, 0], sizes = [8, 32], strides = [1, 1]} : vector<8x96xf32> to vector<8x32xf32>
    %44 = arith.truncf %43 : vector<8x32xf32> to vector<8x32xbf16>
    %45 = vector.extract_strided_slice %42 {offsets = [0, 32], sizes = [8, 32], strides = [1, 1]} : vector<8x96xf32> to vector<8x32xf32>
    %46 = arith.truncf %45 : vector<8x32xf32> to vector<8x32xbf16>
    %47 = vector.extract_strided_slice %42 {offsets = [0, 64], sizes = [8, 32], strides = [1, 1]} : vector<8x96xf32> to vector<8x32xf32>
    %48 = arith.truncf %47 : vector<8x32xf32> to vector<8x32xbf16>
    %49 = vector.extract_strided_slice %44 {offsets = [0, 0], sizes = [8, 16], strides = [1, 1]} : vector<8x32xbf16> to vector<8x16xbf16>
    %50 = vector.extract_strided_slice %46 {offsets = [0, 0], sizes = [8, 16], strides = [1, 1]} : vector<8x32xbf16> to vector<8x16xbf16>
    %cst_25 = arith.constant dense<0.000000e+00> : vector<8x8xf32>
    %51 = tpu.matmul %49, %50, %cst_25 {dimension_numbers = #tpu.dot_dimension_numbers<[1], [1], [0], [0], [0, 0, 1, 0], [], []>} : vector<8x16xbf16>, vector<8x16xbf16>, vector<8x8xf32> -> vector<8x8xf32>
    %52 = vector.broadcast %12 : vector<1x8xf32> to vector<8x8xf32>
    %53 = arith.addf %51, %52 : vector<8x8xf32>
    %cst_26 = arith.constant dense<0xFF800000> : vector<8xf32>
    %54 = vector.multi_reduction <maximumf>, %53, %cst_26 [1] : vector<8x8xf32> to vector<8xf32>
    %55 = vector.shape_cast %54 : vector<8xf32> to vector<8x1xf32>
    %56 = vector.broadcast %55 : vector<8x1xf32> to vector<8x8xf32>
    %57 = arith.subf %53, %56 : vector<8x8xf32>
    %58 = math.exp %57 : vector<8x8xf32>
    %cst_27 = arith.constant dense<0.000000e+00> : vector<8xf32>
    %59 = vector.multi_reduction <add>, %58, %cst_27 [1] : vector<8x8xf32> to vector<8xf32>
    %60 = vector.shape_cast %59 : vector<8xf32> to vector<8x1xf32>
    %61 = tpu.reciprocal %60 {approx = true} : vector<8x1xf32> -> vector<8x1xf32>
    %62 = vector.broadcast %61 : vector<8x1xf32> to vector<8x8xf32>
    %63 = arith.mulf %58, %62 : vector<8x8xf32>
    %64 = arith.truncf %63 : vector<8x8xf32> to vector<8x8xbf16>
    %65 = vector.extract_strided_slice %48 {offsets = [0, 0], sizes = [8, 16], strides = [1, 1]} : vector<8x32xbf16> to vector<8x16xbf16>
    %cst_28 = arith.constant dense<0.000000e+00> : vector<8x16xf32>
    %66 = tpu.matmul %64, %65, %cst_28 {dimension_numbers = #tpu.dot_dimension_numbers<[1], [0], [0], [1], [0, 0, 1, 1], [], []>} : vector<8x8xbf16>, vector<8x16xbf16>, vector<8x16xf32> -> vector<8x16xf32>
    %c0_29 = arith.constant 0 : index
    %c0_30 = arith.constant 0 : index
    %67 = vector.load %arg16[%c0_29, %c0_30] : memref<8x32xf32, #tpu.memory_space<vmem>>, vector<8x16xf32>
    tpu.vector_store %arg16[%c0_29, %c0_30], %66 {strides = array<i32>} : memref<8x32xf32, #tpu.memory_space<vmem>>, vector<8x16xf32>,
    %68 = vector.extract_strided_slice %44 {offsets = [0, 16], sizes = [8, 16], strides = [1, 1]} : vector<8x32xbf16> to vector<8x16xbf16>
    %69 = vector.extract_strided_slice %46 {offsets = [0, 16], sizes = [8, 16], strides = [1, 1]} : vector<8x32xbf16> to vector<8x16xbf16>
    %cst_31 = arith.constant dense<0.000000e+00> : vector<8x8xf32>
    %70 = tpu.matmul %68, %69, %cst_31 {dimension_numbers = #tpu.dot_dimension_numbers<[1], [1], [0], [0], [0, 0, 1, 0], [], []>} : vector<8x16xbf16>, vector<8x16xbf16>, vector<8x8xf32> -> vector<8x8xf32>
    %71 = vector.broadcast %12 : vector<1x8xf32> to vector<8x8xf32>
    %72 = arith.addf %70, %71 : vector<8x8xf32>
    %cst_32 = arith.constant dense<0xFF800000> : vector<8xf32>
    %73 = vector.multi_reduction <maximumf>, %72, %cst_32 [1] : vector<8x8xf32> to vector<8xf32>
    %74 = vector.shape_cast %73 : vector<8xf32> to vector<8x1xf32>
    %75 = vector.broadcast %74 : vector<8x1xf32> to vector<8x8xf32>
    %76 = arith.subf %72, %75 : vector<8x8xf32>
    %77 = math.exp %76 : vector<8x8xf32>
    %cst_33 = arith.constant dense<0.000000e+00> : vector<8xf32>
    %78 = vector.multi_reduction <add>, %77, %cst_33 [1] : vector<8x8xf32> to vector<8xf32>
    %79 = vector.shape_cast %78 : vector<8xf32> to vector<8x1xf32>
    %80 = tpu.reciprocal %79 {approx = true} : vector<8x1xf32> -> vector<8x1xf32>
    %81 = vector.broadcast %80 : vector<8x1xf32> to vector<8x8xf32>
    %82 = arith.mulf %77, %81 : vector<8x8xf32>
    %83 = arith.truncf %82 : vector<8x8xf32> to vector<8x8xbf16>
    %84 = vector.extract_strided_slice %48 {offsets = [0, 16], sizes = [8, 16], strides = [1, 1]} : vector<8x32xbf16> to vector<8x16xbf16>
    %cst_34 = arith.constant dense<0.000000e+00> : vector<8x16xf32>
    %85 = tpu.matmul %83, %84, %cst_34 {dimension_numbers = #tpu.dot_dimension_numbers<[1], [0], [0], [1], [0, 0, 1, 1], [], []>} : vector<8x8xbf16>, vector<8x16xbf16>, vector<8x16xf32> -> vector<8x16xf32>
    %c0_35 = arith.constant 0 : index
    %c16 = arith.constant 16 : index
    %86 = vector.load %arg16[%c0_35, %c16] : memref<8x32xf32, #tpu.memory_space<vmem>>, vector<8x16xf32>
    tpu.vector_store %arg16[%c0_35, %c16], %85 {strides = array<i32>} : memref<8x32xf32, #tpu.memory_space<vmem>>, vector<8x16xf32>,
    %c0_36 = arith.constant 0 : index
    %c0_37 = arith.constant 0 : index
    %87 = vector.load %arg16[%c0_36, %c0_37] : memref<8x32xf32, #tpu.memory_space<vmem>>, vector<8x32xf32>
    %88 = vector.broadcast %6 : vector<8x1xf32> to vector<8x32xf32>
    %89 = arith.mulf %87, %88 : vector<8x32xf32>
    %90 = arith.truncf %89 : vector<8x32xf32> to vector<8x32xbf16>
    %c0_38 = arith.constant 0 : index
    %c0_39 = arith.constant 0 : index
    %c0_40 = arith.constant 0 : index
    %91 = vector.load %arg8[%c0_38, %c0_39, %c0_40] : memref<1x32x32xbf16, #tpu.memory_space<vmem>>, vector<1x32x32xbf16>
    %92 = vector.shape_cast %91 : vector<1x32x32xbf16> to vector<32x32xbf16>
    %cst_41 = arith.constant dense<0.000000e+00> : vector<8x32xf32>
    %93 = tpu.matmul %90, %92, %cst_41 {dimension_numbers = #tpu.dot_dimension_numbers<[1], [0], [0], [1], [0, 0, 1, 1], [], []>} : vector<8x32xbf16>, vector<32x32xbf16>, vector<8x32xf32> -> vector<8x32xf32>
    %94 = arith.addf %4, %93 : vector<8x32xf32>
    %c0_42 = arith.constant 0 : index
    %c0_43 = arith.constant 0 : index
    %c0_44 = arith.constant 0 : index
    %95 = vector.load %arg9[%c0_42, %c0_43, %c0_44] : memref<1x1x32xf32, #tpu.memory_space<vmem>>, vector<1x1x32xf32>
    %96 = vector.shape_cast %95 : vector<1x1x32xf32> to vector<1x32xf32>
    %c0_45 = arith.constant 0 : index
    %c0_46 = arith.constant 0 : index
    %c0_47 = arith.constant 0 : index
    %97 = vector.load %arg10[%c0_45, %c0_46, %c0_47] : memref<1x1x32xf32, #tpu.memory_space<vmem>>, vector<1x1x32xf32>
    %98 = vector.shape_cast %97 : vector<1x1x32xf32> to vector<1x32xf32>
    %cst_48 = arith.constant dense<0.000000e+00> : vector<8xf32>
    %99 = vector.multi_reduction <add>, %94, %cst_48 [1] : vector<8x32xf32> to vector<8xf32>
    %100 = vector.shape_cast %99 : vector<8xf32> to vector<8x1xf32>
    %cst_49 = arith.constant 3.200000e+01 : f32
    %101 = vector.broadcast %cst_49 : f32 to vector<8x1xf32>
    %102 = arith.divf %100, %101 : vector<8x1xf32>
    %103 = vector.broadcast %102 : vector<8x1xf32> to vector<8x32xf32>
    %104 = arith.subf %94, %103 : vector<8x32xf32>
    %105 = arith.mulf %104, %104 : vector<8x32xf32>
    %cst_50 = arith.constant dense<0.000000e+00> : vector<8xf32>
    %106 = vector.multi_reduction <add>, %105, %cst_50 [1] : vector<8x32xf32> to vector<8xf32>
    %107 = vector.shape_cast %106 : vector<8xf32> to vector<8x1xf32>
    %cst_51 = arith.constant 3.200000e+01 : f32
    %108 = vector.broadcast %cst_51 : f32 to vector<8x1xf32>
    %109 = arith.divf %107, %108 : vector<8x1xf32>
    %110 = vector.broadcast %102 : vector<8x1xf32> to vector<8x32xf32>
    %111 = arith.subf %94, %110 : vector<8x32xf32>
    %cst_52 = arith.constant 9.99999974E-6 : f32
    %112 = vector.broadcast %cst_52 : f32 to vector<8x1xf32>
    %113 = arith.addf %109, %112 : vector<8x1xf32>
    %114 = math.rsqrt %113 : vector<8x1xf32>
    %115 = vector.broadcast %114 : vector<8x1xf32> to vector<8x32xf32>
    %116 = arith.mulf %111, %115 : vector<8x32xf32>
    %117 = vector.broadcast %96 : vector<1x32xf32> to vector<8x32xf32>
    %118 = arith.mulf %116, %117 : vector<8x32xf32>
    %119 = vector.broadcast %98 : vector<1x32xf32> to vector<8x32xf32>
    %120 = arith.addf %118, %119 : vector<8x32xf32>
    %121 = arith.truncf %120 : vector<8x32xf32> to vector<8x32xbf16>
    %c0_53 = arith.constant 0 : index
    %c0_54 = arith.constant 0 : index
    %c0_55 = arith.constant 0 : index
    %122 = vector.load %arg11[%c0_53, %c0_54, %c0_55] : memref<1x32x128xbf16, #tpu.memory_space<vmem>>, vector<1x32x128xbf16>
    %123 = vector.shape_cast %122 : vector<1x32x128xbf16> to vector<32x128xbf16>
    %cst_56 = arith.constant dense<0.000000e+00> : vector<8x128xf32>
    %124 = tpu.matmul %121, %123, %cst_56 {dimension_numbers = #tpu.dot_dimension_numbers<[1], [0], [0], [1], [0, 0, 1, 1], [], []>} : vector<8x32xbf16>, vector<32x128xbf16>, vector<8x128xf32> -> vector<8x128xf32>
    %c0_57 = arith.constant 0 : index
    %c0_58 = arith.constant 0 : index
    %c0_59 = arith.constant 0 : index
    %125 = vector.load %arg12[%c0_57, %c0_58, %c0_59] : memref<1x1x128xf32, #tpu.memory_space<vmem>>, vector<1x1x128xf32>
    %126 = vector.shape_cast %125 : vector<1x1x128xf32> to vector<1x128xf32>
    %127 = vector.broadcast %126 : vector<1x128xf32> to vector<8x128xf32>
    %128 = arith.addf %124, %127 : vector<8x128xf32>
    %cst_60 = arith.constant 5.000000e-01 : f32
    %129 = vector.broadcast %cst_60 : f32 to vector<8x128xf32>
    %130 = arith.mulf %129, %128 : vector<8x128xf32>
    %cst_61 = arith.constant 0.707106769 : f32
    %131 = vector.broadcast %cst_61 : f32 to vector<8x128xf32>
    %132 = arith.mulf %128, %131 : vector<8x128xf32>
    %cst_62 = arith.constant 0.000000e+00 : f32
    %133 = vector.broadcast %cst_62 : f32 to vector<8x128xf32>
    %134 = arith.cmpf olt, %132, %133 : vector<8x128xf32>
    %cst_63 = arith.constant -1.000000e+00 : f32
    %cst_64 = arith.constant 1.000000e+00 : f32
    %135 = vector.broadcast %cst_63 : f32 to vector<8x128xf32>
    %136 = vector.broadcast %cst_64 : f32 to vector<8x128xf32>
    %137 = arith.select %134, %135, %136 : vector<8x128xi1>, vector<8x128xf32>
    %138 = math.absf %132 : vector<8x128xf32>
    %cst_65 = arith.constant 0.327591091 : f32
    %139 = vector.broadcast %cst_65 : f32 to vector<8x128xf32>
    %140 = arith.mulf %139, %138 : vector<8x128xf32>
    %cst_66 = arith.constant 1.000000e+00 : f32
    %141 = vector.broadcast %cst_66 : f32 to vector<8x128xf32>
    %142 = arith.addf %141, %140 : vector<8x128xf32>
    %cst_67 = arith.constant 1.000000e+00 : f32
    %143 = vector.broadcast %cst_67 : f32 to vector<8x128xf32>
    %144 = arith.divf %143, %142 : vector<8x128xf32>
    %cst_68 = arith.constant 1.06140542 : f32
    %145 = vector.broadcast %cst_68 : f32 to vector<8x128xf32>
    %146 = arith.mulf %144, %145 : vector<8x128xf32>
    %cst_69 = arith.constant -1.45315206 : f32
    %147 = vector.broadcast %cst_69 : f32 to vector<8x128xf32>
    %148 = arith.addf %147, %146 : vector<8x128xf32>
    %149 = arith.mulf %144, %148 : vector<8x128xf32>
    %cst_70 = arith.constant 1.42141378 : f32
    %150 = vector.broadcast %cst_70 : f32 to vector<8x128xf32>
    %151 = arith.addf %150, %149 : vector<8x128xf32>
    %152 = arith.mulf %144, %151 : vector<8x128xf32>
    %cst_71 = arith.constant -0.284496725 : f32
    %153 = vector.broadcast %cst_71 : f32 to vector<8x128xf32>
    %154 = arith.addf %153, %152 : vector<8x128xf32>
    %155 = arith.mulf %144, %154 : vector<8x128xf32>
    %cst_72 = arith.constant 0.254829586 : f32
    %156 = vector.broadcast %cst_72 : f32 to vector<8x128xf32>
    %157 = arith.addf %156, %155 : vector<8x128xf32>
    %158 = arith.mulf %144, %157 : vector<8x128xf32>
    %159 = arith.mulf %138, %138 : vector<8x128xf32>
    %cst_73 = arith.constant 0.000000e+00 : f32
    %160 = vector.broadcast %cst_73 : f32 to vector<8x128xf32>
    %161 = arith.subf %160, %159 : vector<8x128xf32>
    %162 = math.exp %161 : vector<8x128xf32>
    %163 = arith.mulf %158, %162 : vector<8x128xf32>
    %cst_74 = arith.constant 1.000000e+00 : f32
    %164 = vector.broadcast %cst_74 : f32 to vector<8x128xf32>
    %165 = arith.subf %164, %163 : vector<8x128xf32>
    %166 = arith.mulf %137, %165 : vector<8x128xf32>
    %cst_75 = arith.constant 1.000000e+00 : f32
    %167 = vector.broadcast %cst_75 : f32 to vector<8x128xf32>
    %168 = arith.addf %167, %166 : vector<8x128xf32>
    %169 = arith.mulf %130, %168 : vector<8x128xf32>
    %170 = arith.truncf %169 : vector<8x128xf32> to vector<8x128xbf16>
    %c0_76 = arith.constant 0 : index
    %c0_77 = arith.constant 0 : index
    %c0_78 = arith.constant 0 : index
    %171 = vector.load %arg13[%c0_76, %c0_77, %c0_78] : memref<1x128x32xbf16, #tpu.memory_space<vmem>>, vector<1x128x32xbf16>
    %172 = vector.shape_cast %171 : vector<1x128x32xbf16> to vector<128x32xbf16>
    %cst_79 = arith.constant dense<0.000000e+00> : vector<8x32xf32>
    %173 = tpu.matmul %170, %172, %cst_79 {dimension_numbers = #tpu.dot_dimension_numbers<[1], [0], [0], [1], [0, 0, 1, 1], [], []>} : vector<8x128xbf16>, vector<128x32xbf16>, vector<8x32xf32> -> vector<8x32xf32>
    %c0_80 = arith.constant 0 : index
    %c0_81 = arith.constant 0 : index
    %c0_82 = arith.constant 0 : index
    %174 = vector.load %arg14[%c0_80, %c0_81, %c0_82] : memref<1x1x32xf32, #tpu.memory_space<vmem>>, vector<1x1x32xf32>
    %175 = vector.shape_cast %174 : vector<1x1x32xf32> to vector<1x32xf32>
    %176 = vector.broadcast %175 : vector<1x32xf32> to vector<8x32xf32>
    %177 = arith.addf %173, %176 : vector<8x32xf32>
    %cst_83 = arith.constant 0.000000e+00 : f32
    %178 = vector.broadcast %cst_83 : f32 to vector<8x1xf32>
    %179 = arith.cmpf ogt, %6, %178 : vector<8x1xf32>
    %cst_84 = arith.constant 0.000000e+00 : f32
    %180 = vector.shape_cast %179 : vector<8x1xi1> to vector<8x1xi1>
    %181 = vector.broadcast %180 : vector<8x1xi1> to vector<8x32xi1>
    %182 = vector.broadcast %cst_84 : f32 to vector<8x32xf32>
    %183 = arith.select %181, %177, %182 : vector<8x32xi1>, vector<8x32xf32>
    %184 = arith.addf %94, %183 : vector<8x32xf32>
    %c0_85 = arith.constant 0 : index
    %c0_86 = arith.constant 0 : index
    %c0_87 = arith.constant 0 : index
    %185 = vector.load %arg15[%c0_85, %c0_86, %c0_87] : memref<1x8x32xf32, #tpu.memory_space<vmem>>, vector<1x8x32xf32>
    %186 = vector.shape_cast %185 : vector<1x8x32xf32> to vector<8x32xf32>
    %187 = vector.shape_cast %184 : vector<8x32xf32> to vector<1x8x32xf32>
    tpu.vector_store %arg15[%c0_85, %c0_86, %c0_87], %187 {strides = array<i32>} : memref<1x8x32xf32, #tpu.memory_space<vmem>>, vector<1x8x32xf32>,
    return
  }
  func.func @transform_0(%arg0: i32, %arg1: i32) -> (i32, i32, i32) {
    %c0_i32 = arith.constant 0 : i32
    %c0_i32_0 = arith.constant 0 : i32
    %c0_i32_1 = arith.constant 0 : i32
    return %arg0, %c0_i32, %c0_i32_0 : i32, i32, i32
  }
  func.func @transform_1(%arg0: i32, %arg1: i32) -> (i32, i32, i32) {
    %c0_i32 = arith.constant 0 : i32
    %c0_i32_0 = arith.constant 0 : i32
    %c0_i32_1 = arith.constant 0 : i32
    return %arg0, %c0_i32, %c0_i32_0 : i32, i32, i32
  }
  func.func @transform_2(%arg0: i32, %arg1: i32) -> (i32, i32, i32) {
    %c0_i32 = arith.constant 0 : i32
    %c0_i32_0 = arith.constant 0 : i32
    %c0_i32_1 = arith.constant 0 : i32
    return %arg0, %c0_i32, %c0_i32_0 : i32, i32, i32
  }
  func.func @transform_3(%arg0: i32, %arg1: i32) -> (i32, i32, i32) {
    %c0_i32 = arith.constant 0 : i32
    %c0_i32_0 = arith.constant 0 : i32
    %c0_i32_1 = arith.constant 0 : i32
    return %arg1, %c0_i32, %c0_i32_0 : i32, i32, i32
  }
  func.func @transform_4(%arg0: i32, %arg1: i32) -> (i32, i32, i32) {
    %c0_i32 = arith.constant 0 : i32
    %c0_i32_0 = arith.constant 0 : i32
    %c0_i32_1 = arith.constant 0 : i32
    return %arg1, %c0_i32, %c0_i32_0 : i32, i32, i32
  }
  func.func @transform_5(%arg0: i32, %arg1: i32) -> (i32, i32, i32) {
    %c0_i32 = arith.constant 0 : i32
    %c0_i32_0 = arith.constant 0 : i32
    %c0_i32_1 = arith.constant 0 : i32
    return %arg1, %c0_i32, %c0_i32_0 : i32, i32, i32
  }
  func.func @transform_6(%arg0: i32, %arg1: i32) -> (i32, i32, i32) {
    %c0_i32 = arith.constant 0 : i32
    %c0_i32_0 = arith.constant 0 : i32
    %c0_i32_1 = arith.constant 0 : i32
    return %arg1, %c0_i32, %c0_i32_0 : i32, i32, i32
  }
  func.func @transform_7(%arg0: i32, %arg1: i32) -> (i32, i32, i32) {
    %c0_i32 = arith.constant 0 : i32
    %c0_i32_0 = arith.constant 0 : i32
    %c0_i32_1 = arith.constant 0 : i32
    return %arg1, %c0_i32, %c0_i32_0 : i32, i32, i32
  }
  func.func @transform_8(%arg0: i32, %arg1: i32) -> (i32, i32, i32) {
    %c0_i32 = arith.constant 0 : i32
    %c0_i32_0 = arith.constant 0 : i32
    %c0_i32_1 = arith.constant 0 : i32
    return %arg1, %c0_i32, %c0_i32_0 : i32, i32, i32
  }
  func.func @transform_9(%arg0: i32, %arg1: i32) -> (i32, i32, i32) {
    %c0_i32 = arith.constant 0 : i32
    %c0_i32_0 = arith.constant 0 : i32
    %c0_i32_1 = arith.constant 0 : i32
    return %arg1, %c0_i32, %c0_i32_0 : i32, i32, i32
  }
  func.func @transform_10(%arg0: i32, %arg1: i32) -> (i32, i32, i32) {
    %c0_i32 = arith.constant 0 : i32
    %c0_i32_0 = arith.constant 0 : i32
    %c0_i32_1 = arith.constant 0 : i32
    return %arg1, %c0_i32, %c0_i32_0 : i32, i32, i32
  }
  func.func @transform_11(%arg0: i32, %arg1: i32) -> (i32, i32, i32) {
    %c0_i32 = arith.constant 0 : i32
    %c0_i32_0 = arith.constant 0 : i32
    %c0_i32_1 = arith.constant 0 : i32
    return %arg1, %c0_i32, %c0_i32_0 : i32, i32, i32
  }
  func.func @transform_12(%arg0: i32, %arg1: i32) -> (i32, i32, i32) {
    %c0_i32 = arith.constant 0 : i32
    %c0_i32_0 = arith.constant 0 : i32
    %c0_i32_1 = arith.constant 0 : i32
    return %arg1, %c0_i32, %c0_i32_0 : i32, i32, i32
  }
  func.func @transform_13(%arg0: i32, %arg1: i32) -> (i32, i32, i32) {
    %c0_i32 = arith.constant 0 : i32
    %c0_i32_0 = arith.constant 0 : i32
    %c0_i32_1 = arith.constant 0 : i32
    return %arg0, %c0_i32, %c0_i32_0 : i32, i32, i32
  }
}

</mosaic_0001>

<bundles_post_ra>
// kernel: tpu_custom_call.1
= control target key start
LH: loop header
LB: loop body
LE: loop exit
PB: predicated region body
PF: predicated region fallthrough
CT: control target
= control target key end

     0   :  { %s2257_s0 = inlined_call_operand.vmem [shape: f32[2,8,1], index: 0, kind: input, shape index: {}]   ;;  %s2258_s1 = inlined_call_operand.vmem [shape: f32[2,1,8], index: 1, kind: input, shape index: {}]   ;;  %s2259_s2 = inlined_call_operand.vmem [shape: f32[2,8,32], index: 2, kind: input, shape index: {}]   ;;  %s2260_s3 = inlined_call_operand.vmem [shape: f32[2,1,32], index: 3, kind: input, shape index: {}]   ;;  %s2261_s4 = inlined_call_operand.vmem [shape: f32[2,1,32], index: 4, kind: input, shape index: {}]   ;;  %s2262_s5 = inlined_call_operand.vmem [shape: bf16[2,32,96], index: 5, kind: input, shape index: {}]   ;;  %s2263_s6 = inlined_call_operand.vmem [shape: bf16[2,32,32], index: 6, kind: input, shape index: {}]   ;;  %s2264_s7 = inlined_call_operand.vmem [shape: f32[2,1,32], index: 7, kind: input, shape index: {}]   ;;  %s2265_s8 = inlined_call_operand.vmem [shape: f32[2,1,32], index: 8, kind: input, shape index: {}]   ;;  %s2266_s9 = inlined_call_operand.vmem [shape: bf16[2,32,128], index: 9, kind: input, shape index: {}]   ;;  %s2267_s10 = inlined_call_operand.vmem [shape: f32[2,1,128], index: 10, kind: input, shape index: {}]   ;;  %s2268_s11 = inlined_call_operand.vmem [shape: bf16[2,128,32], index: 11, kind: input, shape index: {}]   ;;  %s2269_s12 = inlined_call_operand.vmem [shape: f32[2,1,32], index: 12, kind: input, shape index: {}]   ;;  %s2270_s13 = inlined_call_operand.hbm [shape: f32[2,8,32], index: 13, kind: output, shape index: {}]  }
   0x1   :  { %2286 = sst [smem:[#allocation19_spill]] %s2257_s0 }
   0x2   :  { %2287 = sst [smem:[#allocation20_spill]] %s2259_s2 }
   0x3   :  { %2288 = sst [smem:[#allocation21_spill]] %s2262_s5 }
   0x4   :  { %2289 = sst [smem:[#allocation22_spill]] %s2263_s6 }
   0x5   :  { %2290 = sst [smem:[#allocation23_spill]] %s2264_s7 }
   0x6   :  { %2291 = sst [smem:[#allocation24_spill]] %s2268_s11 }
   0x7   :  { %2292 = sst [smem:[#allocation25_spill]] %s2269_s12 }
   0x8   :  { %2293 = sst [smem:[#allocation26_spill]] %s2270_s13 }
   0x9   :  { %18 = vsyncpa [#allocation4], 0 }
   0xa   :  { %20 = vsyncpa [#allocation4 + $0x1], 0  ;;  %s1939_s25 = smov 0   ;;  %s1941_s26 = smov 0  }
   0xb   :  { %s1943_s27 = smov 0   ;;  %s1945_s28 = smov 0  }
   0xc   :  { %s1947_s29 = smov 0   ;;  %s1949_s30 = smov 0  }
   0xd   :  { %s1951_s14 = smov 0   ;;  %s1953_s15 = smov 0  }
   0xe LB: > { %2294 = sst [smem:[#allocation6_spill]] %s1828_s25  ;;  %s1502_s16 = sadd.s32 4294967295, %s1856_s15   ;;  %s1856_s15 = sphi %s1953_s15, %s26_s15   ;;  %s1852_s14 = sphi %s1951_s14, %s2338_s14   ;;  %s1848_s30 = sphi %s1949_s30, %s2337_s30   ;;  %s1844_s29 = sphi %s1947_s29, %s2336_s29   ;;  %s1840_s28 = sphi %s1945_s28, %s2335_s28   ;;  %s1836_s27 = sphi %s1943_s27, %s2334_s27   ;;  %s1832_s26 = sphi %s1941_s26, %s2333_s26   ;;  %s1828_s25 = sphi %s1939_s25, %s2332_s25  }
   0xf   : > { %2295 = sst [smem:[#allocation7_spill]] %s1832_s26  ;;  %s1503_s17 = sadd.s32 4294967294, %s1856_s15  }
  0x10   : > { %2296 = sst [smem:[#allocation8_spill]] %s1836_s27  ;;  %s35_s18 = sadd.s32 1, %s1848_s30 }
  0x11   : > { %2297 = sst [smem:[#allocation9_spill]] %s1840_s28  ;;  %p36_p0 = scmp.ge.s32.totalorder %s35_s18, 2 }
  0x12   : > { %2298 = sst [smem:[#allocation10_spill]] %s1844_s29  ;;  %s38_s19 = sadd.s32 1, %s1852_s14 }
  0x13   : > { %2299 = sst [smem:[#allocation11_spill]] %s1848_s30  ;;  %p393_p1 = scmp.ne.s32.totalorder %s1836_s27, %s1832_s26 }
  0x14   : > { %2300 = sst [smem:[#allocation12_spill]] %s1852_s14  ;;  %p394_p2 = scmp.eq.s32.totalorder %s1502_s16, 3 }
  0x15   : > { %2301 = sst [smem:[#allocation13_spill]] %s1856_s15  ;;  %s2340_s18 = smov (%p36_p0, %s35_s18), 0 }
  0x16   : > { %2302 = sst [smem:[#allocation14_spill]] %s2340_s18  ;;  %s2342_s19 = smov (!%p36_p0, %s38_s19), %s1852_s14 }
  0x17   : > { %p1988_p3 = por %p394_p2, %p393_p1  ;;  %p399_p4 = scmp.ne.s32.totalorder %s1832_s26, %s1828_s25 }
  0x18   : > { %p40_p5 = scmp.ge.s32.totalorder %s2342_s19, 2  ;;  %p400_p6 = scmp.eq.s32.totalorder %s1503_s17, 3 }
  0x19   : > { %s2303_s20 = scalar_select %p1988_p3, 1, 0 }
  0x1a   : > { %p1506_p7 = scmp.ge.s32.totalorder %s1856_s15, 1  ;;  %p506_p8 = scmp.lt.s32.totalorder %s1856_s15, 5 }
  0x1b   : > { %2304 = sst [smem:[#allocation15_spill]] %s2303_s20  ;;  %s2344_s19 = smov (%p40_p5, %s2342_s19), 0 }
  0x1c   : > { %2305 = sst [smem:[#allocation16_spill]] %s2344_s19  ;;  %p1998_p9 = por %p400_p6, %p399_p4 }
  0x1d   : > { %p507_p10 = pnand %p1506_p7, %p506_p8  ;;  %s380_s22 = ssub.s32 %s1852_s14, %s2344_s19 }
  0x1e   : > { %s2306_s21 = scalar_select %p1998_p9, 1, 0 }
  0x1f   : > { %s383_s23 = sadd.s32 1, %s1836_s27  ;;  %p381_p11 = scmp.eq.s32.totalorder %s380_s22, 0 }
  0x20   : > { %2307 = sst [smem:[#allocation17_spill]] %s2306_s21  ;;  %510 = sbr.rel (%p507_p10) target bundleno = 2624 (0xa40), region = 72 }
  0x21   : > { %s2006_s24 = scalar_select %p381_p11, %s1836_s27, %s383_s23  }
  0x22   : > { %s2273_s16 = sand.u32 (!%p507_p10), 1, %s1832_s26   ;;  %p594_p12 = scmp.lt.s32.totalorder (!%p507_p10), %s1844_s29, 1 }
  0x23   : > { %2308 = sst [smem:[#allocation18_spill]] %s2006_s24  ;;  %s1507_s17 = sshll.u32 (!%p507_p10), %s2273_s16, 3 }
  0x24   : > { %p605_p13 = scmp.lt.s32.totalorder (!%p507_p10), %s1840_s28, 1  ;;  %s2309_s0 = sld [smem:[#allocation19_spill]] (!%p507_p10) }
  0x25   : > { %s2310_s2 = sld [smem:[#allocation20_spill]] (!%p507_p10)  ;;  %s2312_s5 = sld [smem:[#allocation21_spill]] (!%p507_p10) }
  0x26   : > { %s2313_s6 = sld [smem:[#allocation22_spill]] (!%p507_p10)  ;;  %s2315_s7 = sld [smem:[#allocation25_spill]] (!%p507_p10) }
  0x27   : > { %s2014_s18 = scalar_select %p594_p12, %s1844_s29, 1 }
  0x28   : > { %s2017_s19 = scalar_select %p605_p13, %s1840_s28, 1 }
  0x29   : > { %s1508_s22 = sshll.u32 %s2014_s18, 3  ;;  %s2078_s20 = scalar_lea.vmem [#allocation3], %s1507_s17 }
  0x2a   : > { %s2027_s27 = scalar_lea.vmem %s2309_s0, %s1508_s22  ;;  %s1551_s11 = sshll.u32 %s2017_s19, 4 }
  0x2b   : > { %s604_s15 = scalar_lea.vmem %s2310_s2, %s1508_s22  ;;  %s2048_s0 = scalar_lea.vmem %s2312_s5, %s1551_s11 }
  0x2c   : > { %s2053_s22 = scalar_lea.vmem %s2313_s6, %s1551_s11  ;;  %s2062_s26 = scalar_lea.vmem %s2266_s9, %s1551_s11 }
  0x2d   : > { %s634_s30 = scalar_lea.vmem %s2267_s10, %s2017_s19  ;;  %s1554_s24 = sshll.u32 %s2017_s19, 6 }
  0x2e   : > { %s2314_s5 = sld [smem:[#allocation24_spill]]  ;;  %s642_s13 = scalar_lea.vmem %s2315_s7, %s2017_s19 }
  0x2f   : > { %s2316_s28 = sld [smem:[#allocation9_spill]] }
  0x34   : > { %s2072_s25 = scalar_lea.vmem %s2314_s5, %s1554_s24 }
  0x35   : > { %p1518_p0 = scmp.ne.s32.totalorder %s2316_s28, 0 }
  0x36   : > { %v648_v0 = vld [vmem:[%s604_s15] sm:$0xff] (!%p1518_p0)  ;;  %vm649_vm0 = vcmask (!%p1518_p0), 261120  }
  0x37   : > { %647 = sbr.rel (%p1518_p0) target bundleno = 62 (0x3e), region = 76  ;;  %650 = vst.msk [vmem:[%s2078_s20] sm:$0xff] (!%p1518_p0), %vm649_vm0, %v648_v0 }
  0x3e PF: > { %v2083_v1 = vld [vmem:[%s2078_s20] sm:$0xff]  ;;  %vm658_vm1 = vcmask 261120   ;;  %v1858_v9 = vmov 0.0   ;;  %vm1859_vm2 = vmmov 0   ;;  %v1733_v10 = vld [vmem:[%s2048_s0 + $0x8] sm:$0xff]   ;;  %s2317_s6 = scalar_lea.vmem %s2260_s3, %s2017_s19  ;;  %s2318_s11 = scalar_lea.vmem %s2261_s4, %s2017_s19  ;;  %vm757_vm3 = vcmask 130048  }
  0x3f   : > { %v659_v2 = vsel %vm658_vm1, %v2083_v1, 0.0  ;;  %v1732_v8 = vld [vmem:[%s2048_s0] sm:$0xff]   ;;  %1581 = vmatprep.subr.bf16.mxu0 %v1858_v9  ;;  %1585 = vmatprep.mubr.msk.bf16.mxu0 %vm1859_vm2, %v1858_v9  ;;  %s1860_s12 = smov 112   ;;  %s1861_s15 = smov 96   ;;  %v749_v31 = vlaneseq  ;;  %vm804_vm4 = vcmask 64512   ;;  %vm822_vm5 = vcmask 1043456  }
  0x40   : > { %660 = vadd.xlane.f32.xlu0 %v659_v2  ;;  %1582 = vmatpush3.bf16.msra.mxu0 %v1732_v8  ;;  %v1520_v15 = vld [vmem:[%s2317_s6] ss:$0 sm:$0xff]  ;;  %s1862_s16 = smov 80   ;;  %s2319_s29 = scalar_lea.vmem %s2258_s1, %s2014_s18  ;;  %vm981_vm6 = vcmask 261248  }
  0x41   : > { %1601 = vmatprep.subr.bf16.mxu1 %v1858_v9  ;;  %1583 = vmatprep.subr.bf16.mxu0 %v1858_v9  ;;  %v1521_v17 = vld [vmem:[%s2318_s11] ss:$0 sm:$0xff]  ;;  %v750_v34 = vshrl.u32 %v749_v31, 7  ;;  %s1863_s18 = smov 48   ;;  %s1864_s14 = smov 64  }
  0x42   : > { %1603 = vmatprep.mubr.msk.bf16.mxu1 %vm1859_vm2, %v1858_v9  ;;  %v653_v32 = vld [vmem:[%s2319_s29] sm:$0x1]  ;;  %s1866_s23 = smov 16   ;;  %s2320_s24 = sld [smem:[#allocation23_spill]] }
  0x43   : > { %v1519_v33 = vadd.f32 -1.0, %v653_v32  ;;  %v751_v36 = vsub.s32 0, %v750_v34  ;;  %s1309_s17 = sshll.u32 %s2078_s20, 4  ;;  %s2202_s17 = int_to_ptr.vmem [resolvable:$true] %s1309_s17 }
  0x44   : > { %1584 = vmatpush3.bf16.msra.mxu0 %v1733_v10  ;;  %v1865_v10 = vmov 0  }
  0x45   : > { %1589 = vmatprep.subr.bf16.mxu0 %v1858_v9  ;;  %v655_v35 = vmul.f32 1e+09, %v1519_v33  ;;  %1730 = vset.pattern.permute.xlu1 %v1865_v10 }
  0x46   : > { %1731 = vset.pattern.permute.xlu0 %v1865_v10 }
  0x47   : > { %v752_v37 = vrot.slane %v655_v35, %v751_v36 }
  0x48   : > { %s2321_s21 = scalar_lea.vmem %s2320_s24, %s2017_s19 }
  0xcd   : > { %v661_v3 = vpop.xlane.xlu0 %660 }
  0xce   : > { %v663_v4 = vmul.f32 0.03125, %v661_v3 }
  0xd0   : > { %v664_v5 = vsub.f32 %v2083_v1, %v663_v4 }
  0xd2   : > { %v665_v6 = vmul.f32 %v664_v5, %v664_v5 }
  0xd4   : > { %v666_v7 = vsel %vm658_vm1, %v665_v6, 0.0 }
  0xd5   : > { %667 = vadd.xlane.f32.xlu0 %v666_v7 }
 0x162   : > { %v668_v11 = vpop.xlane.xlu0 %667 }
 0x163   : > { %v669_v12 = vmul.f32 0.03125, %v668_v11  ;;  %v1734_v11 = vld [vmem:[%s2053_s22] sm:$0xff]  }
 0x165   : > { %v670_v13 = vadd.f32 1e-05, %v669_v12 }
 0x167   : > { %1746 = vrsqrt.f32 %v670_v13 }
 0x171   : > { %v1747_v14 = vpop.eup %1746 }
 0x172   : > { %v672_v16 = vmul.f32 %v1747_v14, %v664_v5 }
 0x174   : > { %v679_v18 = vmul.f32 %v1520_v15, %v672_v16 }
 0x176   : > { %v686_v19 = vadd.f32 %v1521_v17, %v679_v18 }
 0x178   : > { %v687_v20 = vpack.c.bf16 %v686_v19, %v686_v19  ;;  %v652_v19 = vld [vmem:[%s2027_s27] sm:$0xff]  ;;  %s1868_s27 = smov [#allocation3]  }
 0x179   : > { %vm1286_vm7 = vcmp.gt.f32.partialorder %v652_v19, 0.0 }
 0x17a   : > { %1586 = vmatmul.mubr.msk.bf16.vlgmr.msra.gmra.mrb[0].mxu0 %vm658_vm1, %v687_v20  ;;  %v1287_v33 = vsel %vm1286_vm7, 1, %v1865_v10 }
 0x17b   : > { %1591 = vmatprep.mubr.msk.bf16.mxu0 %vm1859_vm2, %v1858_v9 }
 0x24d   : > { %v741_v21 = vpop.f32.mrb[0].mxu0 }
 0x24e   : > { %v747_v22 = vpack.c.bf16 %v741_v21, %v741_v21  ;;  %v1587_v23 = vpop.f32.mrb[1].mxu0  ;;  %v1735_v21 = vld [vmem:[%s2053_s22 + $0x8] sm:$0xff]   ;;  %s1766_s22 = sshll.u32 %s1868_s27, 4  ;;  %s1767_s22 = int_to_ptr.vmem [resolvable:$false] %s1766_s22 }
 0x24f   : > { %v744_v24 = vpop.f32.mrb[2].mxu0  ;;  %s1768_s24 = scalar_lea.vmem %s1767_s22, 256  ;;  %p1769_p5 = scmp.lt.s32.totalorder %s2202_s17, %s1767_s22 }
 0x250   : > { %867 = vrot.lane.b32.xlu0 %v747_v22, %s1860_s12  ;;  %755 = vrot.lane.b32.xlu1 %v747_v22, %s1861_s15  ;;  %v1588_v25 = vpop.f32.mrb[3].mxu0  ;;  %s2325_s12 = sld [smem:[#allocation7_spill]] }
 0x254   : > { %869 = vrot.lane.b32.xlu1 %v747_v22, %s1862_s16 }
 0x2c2   : > { %v756_v26 = vpop.permute.xlu1 %755  ;;  %v868_v30 = vpop.permute.xlu0 %867 }
 0x2c3   : > { %v762_v27 = vsel %vm757_vm3, %v756_v26, 0 }
 0x2c4   : > { %1590 = vmatpush3.bf16.xpose.msra.mxu0 %v762_v27 }
 0x2c5   : > { %1595 = vmatprep.subr.bf16.mxu0 %v1858_v9 }
 0x2c6   : > { %v870_v28 = vpop.permute.xlu1 %869 }
 0x2c7   : > { %v875_v29 = vsel %vm757_vm3, %v870_v28, 0 }
 0x2c8   : > { %1602 = vmatpush3.bf16.xpose.msra.mxu1 %v875_v29 }
 0x2c9   : > { %1613 = vmatprep.subr.bf16.mxu1 %v1858_v9 }
 0x2cb   : > { %1592 = vmatmul.mubr.msk.bf16.vlgmr.msra.gmra.mrb[4].mxu0 %vm757_vm3, %v747_v22 }
 0x2cc   : > { %1597 = vmatprep.mubr.msk.bf16.mxu0 %vm1859_vm2, %v1858_v9 }
 0x2cf   : > { %1604 = vmatmul.mubr.msk.bf16.vlgmr.msra.gmra.mrb[0].mxu1 %vm757_vm3, %v868_v30 }
 0x2d0   : > { %1617 = vmatprep.mubr.msk.bf16.mxu1 %vm1859_vm2, %v1858_v9  ;;  %1614 = vmatpush3.bf16.msra.mxu1 %v1734_v11 }
 0x2d1   : > { %1615 = vmatprep.subr.bf16.mxu1 %v1858_v9 }
 0x2d4   : > { %1616 = vmatpush3.bf16.msra.mxu1 %v1735_v21  ;;  %v1867_v21 = vmov 1.0  }
 0x2d5   : > { %1629 = vmatprep.subr.bf16.mxu1 %v1858_v9 }
 0x39e   : > { %v798_v38 = vpop.f32.mrb[4].mxu0 }
 0x39f   : > { %v799_v39 = vadd.f32 %v798_v38, %v752_v37  ;;  %v1593_v40 = vpop.f32.mrb[5].mxu0  ;;  %v1736_v38 = vld [vmem:[%s2062_s26] sm:$0xff]  }
 0x3a0   : > { %v801_v41 = vpop.f32.mrb[6].mxu0 }
 0x3a1   : > { %v1594_v42 = vpop.f32.mrb[7].mxu0  ;;  %v805_v43 = vsel %vm804_vm4, %v799_v39, -inf }
 0x3a2   : > { %v911_v44 = vpop.f32.mrb[0].mxu1  ;;  %806 = vmax.xlane.f32.xlu1 %v805_v43 }
 0x3a3   : > { %v912_v45 = vadd.f32 %v911_v44, %v752_v37  ;;  %v1605_v46 = vpop.f32.mrb[1].mxu1  ;;  %v1532_v44 = vld [vmem:[%s2321_s21] ss:$0 sm:$0xff] }
 0x3a4   : > { %v914_v47 = vpop.f32.mrb[2].mxu1 }
 0x3a5   : > { %v1606_v48 = vpop.f32.mrb[3].mxu1  ;;  %v917_v49 = vsel %vm804_vm4, %v912_v45, -inf }
 0x3a6   : > { %918 = vmax.xlane.f32.xlu0 %v917_v49 }
 0x3bc   : > { %929 = vrot.lane.b32.xlu0 %v747_v22, %s1863_s18  ;;  %s2327_s18 = sld [smem:[#allocation26_spill]] }
 0x42f   : > { %v807_v50 = vpop.xlane.xlu1 %806 }
 0x430   : > { %v808_v51 = vsub.f32 %v799_v39, %v807_v50  ;;  %v1737_v39 = vld [vmem:[%s2062_s26 + $0x8] sm:$0xff]   ;;  %s2322_s26 = scalar_lea.vmem %s2265_s8, %s2017_s19  ;;  %v1738_v50 = vld [vmem:[%s2072_s25] sm:$0xff]   ;;  %s2328_s19 = sand.u32 1, %s2325_s12  }
 0x431   : > { %v1533_v46 = vld [vmem:[%s2322_s26] ss:$0 sm:$0xff] }
 0x432   : > { %v809_v52 = vmul.f32 1.442695, %v808_v51  ;;  %v1739_v51 = vld [vmem:[%s2072_s25 + $0x8] sm:$0xff]  }
 0x433   : > { %v919_v53 = vpop.xlane.xlu0 %918 }
 0x434   : > { %1748 = vpow2.f32 %v809_v52  ;;  %v920_v54 = vsub.f32 %v912_v45, %v919_v53  ;;  %v1740_v52 = vld [vmem:[%s2072_s25 + $0x10] sm:$0xff]   ;;  %v1741_v53 = vld [vmem:[%s2072_s25 + $0x18] sm:$0xff]  }
 0x436   : > { %v921_v55 = vmul.f32 1.442695, %v920_v54  ;;  %v1742_v54 = vld [vmem:[%s2072_s25 + $0x20] sm:$0xff]  }
 0x437   : > { %v930_v3 = vpop.permute.xlu0 %929 }
 0x438   : > { %1750 = vpow2.f32 %v921_v55  ;;  %v935_v6 = vsel %vm822_vm5, %v930_v3, 0  ;;  %v1743_v55 = vld [vmem:[%s2072_s25 + $0x28] sm:$0xff]  }
 0x43e   : > { %v1749_v56 = vpop.eup %1748 }
 0x43f   : > { %v811_v57 = vsel %vm804_vm4, %v1749_v56, 0.0 }
 0x440   : > { %812 = vadd.xlane.f32.xlu1 %v811_v57  ;;  %v1745_v57 = vld [vmem:[%s2072_s25 + $0x38] sm:$0xff]  }
 0x442   : > { %v1751_v58 = vpop.eup %1750 }
 0x443   : > { %v923_v59 = vsel %vm804_vm4, %v1751_v58, 0.0 }
 0x444   : > { %924 = vadd.xlane.f32.xlu1 %v923_v59 }
 0x455   : > { %817 = vrot.lane.b32.xlu1 %v747_v22, %s1864_s14 }
 0x4cd   : > { %v813_v60 = vpop.xlane.xlu1 %812 }
 0x4ce   : > { %1752 = vrcp.f32 %v813_v60 }
 0x4d1   : > { %v925_v61 = vpop.xlane.xlu1 %924 }
 0x4d2   : > { %1754 = vrcp.f32 %v925_v61 }
 0x4d5   : > { %v818_v62 = vpop.permute.xlu1 %817 }
 0x4d6   : > { %v824_v63 = vsel %vm822_vm5, %v818_v62, 0 }
 0x4d7   : > { %1596 = vmatpush3.bf16.msra.mxu0 %v824_v63 }
 0x4d8   : > { %v1753_v0 = vpop.eup %1752  ;;  %1607 = vmatprep.subr.bf16.mxu0 %v1858_v9 }
 0x4d9   : > { %v815_v2 = vmul.f32 %v1753_v0, %v1749_v56  ;;  %v1744_v56 = vld [vmem:[%s2072_s25 + $0x30] sm:$0xff]  }
 0x4db   : > { %v816_v4 = vpack.c.bf16 %v815_v2, %v815_v2 }
 0x4dc   : > { %v1755_v5 = vpop.eup %1754 }
 0x4dd   : > { %1598 = vmatmul.mubr.msk.bf16.vlgmr.msra.gmra.mrb[8].mxu0 %vm804_vm4, %v816_v4  ;;  %v927_v7 = vmul.f32 %v1755_v5, %v1751_v58  ;;  %v1534_v58 = vld [vmem:[%s634_s30] ss:$0 sm:$0xff]  ;;  %s2323_s30 = sld [smem:[#allocation10_spill]] }
 0x4de   : > { %1608 = vmatpush3.bf16.msra.mxu0 %v935_v6  ;;  %1609 = vmatprep.mubr.msk.bf16.mxu0 %vm1859_vm2, %v1858_v9 }
 0x4df   : > { %1621 = vmatprep.subr.bf16.mxu0 %v1858_v9  ;;  %v928_v8 = vpack.c.bf16 %v927_v7, %v927_v7 }
 0x4e3   : > { %s1548_s16 = sshll.u32 %s2323_s30, 7 }
 0x4e4   : > { %s2200_s14 = scalar_lea.hbm %s2327_s18, %s1548_s16 }
 0x4e5   : > { %1610 = vmatmul.mubr.msk.bf16.vlgmr.msra.gmra.mrb[12].mxu0 %vm804_vm4, %v928_v8 }
 0x4e6   : > { %1625 = vmatprep.mubr.msk.bf16.mxu0 %vm1859_vm2, %v1858_v9  ;;  %1622 = vmatpush3.bf16.msra.mxu0 %v1736_v38 }
 0x4e7   : > { %1623 = vmatprep.subr.bf16.mxu0 %v1858_v9 }
 0x4ea   : > { %1624 = vmatpush3.bf16.msra.mxu0 %v1737_v39 }
 0x5b0   : > { %v860_v12 = vpop.f32.mrb[8].mxu0 }
 0x5b1   : > { %866 = vst.msk [vmem:[#allocation2] sm:$0xff] %vm757_vm3, %v860_v12  ;;  %v1599_v13 = vpop.f32.mrb[9].mxu0 }
 0x5b2   : > { %v863_v14 = vpop.f32.mrb[10].mxu0 }
 0x5b3   : > { %v1600_v15 = vpop.f32.mrb[11].mxu0 }
 0x5b8   : > { %v971_v16 = vpop.f32.mrb[12].mxu0 }
 0x5b9   : > { %978 = vrot.lane.b32.xlu1 %v971_v16, %s1866_s23  ;;  %v1611_v17 = vpop.f32.mrb[13].mxu0  ;;  %s1762_s23 = scalar_lea.vmem %s2202_s17, 128 }
 0x5ba   : > { %v974_v18 = vpop.f32.mrb[14].mxu0  ;;  %p1763_p1 = scmp.ne.s32.totalorder %s2202_s17, %s1762_s23  ;;  %p1770_p6 = scmp.lt.s32.totalorder %s1768_s24, %s1762_s23 }
 0x5bb   : > { %v1612_v20 = vpop.f32.mrb[15].mxu0 }
 0x5bc   : > { %p1764_p2 = pnand %p1763_p1, %p1988_p3  ;;  %p1771_p7 = por %p1770_p6, %p1769_p5 }
 0x5bd   : > { %986 = vperm.xlu1 %1730, %v652_v19  }
 0x5be   : > { %p1765_p4 = pneg %p1764_p2 }
 0x5c0   : > { %p1772_p8 = pnand %p1771_p7, %p1765_p4 }
 0x62b   : > { %v979_v22 = vpop.permute.xlu1 %978 }
 0x62c   : > { %982 = vst.msk [vmem:[#allocation2] sm:$0xff] %vm981_vm6, %v979_v22 }
 0x633   : > { %v983_v23 = vld [vmem:[#allocation2] sm:$0xff] }
 0x63c   : > { %v987_v24 = vpop.permute.xlu1 %986 }
 0x63d   : > { %v989_v25 = vmul.f32 %v987_v24, %v983_v23 }
 0x63f   : > { %v990_v26 = vpack.c.bf16 %v989_v25, %v989_v25 }
 0x641   : > { %1618 = vmatmul.mubr.msk.bf16.vlgmr.msra.gmra.mrb[4].mxu1 %vm658_vm1, %v990_v26 }
 0x642   : > { %1645 = vmatprep.mubr.msk.bf16.mxu1 %vm1859_vm2, %v1858_v9  ;;  %1630 = vmatpush3.bf16.msra.mxu1 %v1738_v50 }
 0x643   : > { %1631 = vmatprep.subr.bf16.mxu1 %v1858_v9 }
 0x646   : > { %1632 = vmatpush3.bf16.msra.mxu1 %v1739_v51 }
 0x647   : > { %1633 = vmatprep.subr.bf16.mxu1 %v1858_v9 }
 0x64a   : > { %1634 = vmatpush3.bf16.msra.mxu1 %v1740_v52 }
 0x64b   : > { %1635 = vmatprep.subr.bf16.mxu1 %v1858_v9 }
 0x64e   : > { %1636 = vmatpush3.bf16.msra.mxu1 %v1741_v53 }
 0x64f   : > { %1637 = vmatprep.subr.bf16.mxu1 %v1858_v9 }
 0x652   : > { %1638 = vmatpush3.bf16.msra.mxu1 %v1742_v54 }
 0x653   : > { %1639 = vmatprep.subr.bf16.mxu1 %v1858_v9 }
 0x656   : > { %1640 = vmatpush3.bf16.msra.mxu1 %v1743_v55 }
 0x657   : > { %1641 = vmatprep.subr.bf16.mxu1 %v1858_v9 }
 0x65a   : > { %1642 = vmatpush3.bf16.msra.mxu1 %v1744_v56 }
 0x65b   : > { %1643 = vmatprep.subr.bf16.mxu1 %v1858_v9 }
 0x65e   : > { %1644 = vmatpush3.bf16.msra.mxu1 %v1745_v57 }
 0x714   : > { %v1044_v27 = vpop.f32.mrb[4].mxu1 }
 0x715   : > { %v2149_v28 = vadd.f32 %v1044_v27, %v2083_v1  ;;  %v1619_v29 = vpop.f32.mrb[5].mxu1 }
 0x716   : > { %v1047_v30 = vpop.f32.mrb[6].mxu1  ;;  %v1538_v29 = vld [vmem:[%s642_s13] ss:$0 sm:$0xff]  ;;  %s1296_s13 = scalar_lea.sflag [#allocation4], %s2328_s19 }
 0x717   : > { %v1620_v31 = vpop.f32.mrb[7].mxu1  ;;  %v1053_v32 = vsel %vm658_vm1, %v2149_v28, 0.0 }
 0x718   : > { %1054 = vadd.xlane.f32.xlu1 %v1053_v32 }
 0x729   : > { %1289 = vperm.xlu1 %1730, %v1287_v33  }
 0x7a5   : > { %v1055_v34 = vpop.xlane.xlu1 %1054 }
 0x7a6   : > { %v1056_v35 = vmul.f32 0.03125, %v1055_v34 }
 0x7a8   : > { %v1057_v36 = vsub.f32 %v2149_v28, %v1056_v35 }
 0x7a9   : > { %v1290_v30 = vpop.permute.xlu1 %1289 }
 0x7aa   : > { %v1058_v37 = vmul.f32 %v1057_v36, %v1057_v36  ;;  %vm1291_vm9 = vcmp.eq.s32.totalorder %v1290_v30, 1 }
 0x7ac   : > { %v1059_v1 = vsel %vm658_vm1, %v1058_v37, 0.0 }
 0x7ad   : > { %1060 = vadd.xlane.f32.xlu0 %v1059_v1 }
 0x83a   : > { %v1061_v40 = vpop.xlane.xlu0 %1060 }
 0x83b   : > { %v1062_v41 = vmul.f32 0.03125, %v1061_v40 }
 0x83d   : > { %v1063_v42 = vadd.f32 1e-05, %v1062_v41 }
 0x83f   : > { %1756 = vrsqrt.f32 %v1063_v42 }
 0x849   : > { %v1757_v43 = vpop.eup %1756 }
 0x84a   : > { %v1065_v45 = vmul.f32 %v1757_v43, %v1057_v36 }
 0x84c   : > { %v1072_v47 = vmul.f32 %v1532_v44, %v1065_v45 }
 0x84e   : > { %v1079_v48 = vadd.f32 %v1533_v46, %v1072_v47 }
 0x850   : > { %v1080_v49 = vpack.c.bf16 %v1079_v48, %v1079_v48 }
 0x852   : > { %1626 = vmatmul.mubr.msk.bf16.vlgmr.msra.gmra.mrb[16].mxu0 %vm658_vm1, %v1080_v49 }
 0x925   : > { %v1141_v59 = vpop.f32.mrb[16].mxu0 }
 0x926   : > { %v1142_v60 = vadd.f32 %v1534_v58, %v1141_v59  ;;  %v1627_v61 = vpop.f32.mrb[17].mxu0 }
 0x927   : > { %v1144_v62 = vpop.f32.mrb[18].mxu0 }
 0x928   : > { %v1148_v63 = vmul.f32 0.70710677, %v1142_v60  ;;  %v1628_v0 = vpop.f32.mrb[19].mxu0  ;;  %v1147_v24 = vmul.f32 0.5, %v1142_v60 }
 0x92a   : > { %v1151_v2 = vand.u32 2147483647, %v1148_v63  ;;  %vm1149_vm8 = vcmp.lt.f32.partialorder %v1148_v63, 0.0 }
 0x92b   : > { %v1150_v22 = vsel %vm1149_vm8, -1.0, %v1867_v21 }
 0x92c   : > { %v1152_v3 = vmul.f32 0.3275911, %v1151_v2  ;;  %v1165_v5 = vmul.f32 %v1151_v2, %v1151_v2 }
 0x92e   : > { %v1153_v4 = vadd.f32 1.0, %v1152_v3  ;;  %v1166_v9 = vsub.f32 0.0, %v1165_v5 }
 0x930   : > { %1758 = vrcp.f32 %v1153_v4  ;;  %v1167_v10 = vmul.f32 1.442695, %v1166_v9 }
 0x932   : > { %1760 = vpow2.f32 %v1167_v10 }
 0x93a   : > { %v1759_v6 = vpop.eup %1758 }
 0x93b   : > { %v1156_v7 = vmul.f32 1.0614054, %v1759_v6 }
 0x93c   : > { %v1761_v18 = vpop.eup %1760 }
 0x93d   : > { %v1157_v8 = vadd.f32 -1.4531521, %v1156_v7 }
 0x93f   : > { %v1158_v11 = vmul.f32 %v1759_v6, %v1157_v8 }
 0x941   : > { %v1159_v12 = vadd.f32 1.4214138, %v1158_v11 }
 0x943   : > { %v1160_v13 = vmul.f32 %v1759_v6, %v1159_v12 }
 0x945   : > { %v1161_v14 = vadd.f32 -0.28449672, %v1160_v13 }
 0x947   : > { %v1162_v15 = vmul.f32 %v1759_v6, %v1161_v14 }
 0x949   : > { %v1163_v16 = vadd.f32 0.2548296, %v1162_v15 }
 0x94b   : > { %v1164_v17 = vmul.f32 %v1759_v6, %v1163_v16 }
 0x94d   : > { %v1169_v19 = vmul.f32 %v1761_v18, %v1164_v17 }
 0x94f   : > { %v1170_v20 = vsub.f32 1.0, %v1169_v19 }
 0x951   : > { %v1171_v23 = vmul.f32 %v1170_v20, %v1150_v22 }
 0x953   : > { %v1172_v25 = vadd.f32 1.0, %v1171_v23 }
 0x955   : > { %v1173_v26 = vmul.f32 %v1172_v25, %v1147_v24 }
 0x957   : > { %v1174_v27 = vpack.c.bf16 %v1173_v26, %v1173_v26 }
 0x959   : > { %1646 = vmatmul.mubr.bf16.vlgmr.msra.gmra.mrb[8].mxu1 %v1174_v27 }
 0xa2c   : > { %v1280_v31 = vpop.f32.mrb[8].mxu1 }
 0xa2d   : > { %v1281_v32 = vadd.f32 %v1538_v29, %v1280_v31  ;;  %v1647_v33 = vpop.f32.mrb[9].mxu1 }
 0xa2e   : > { %v1283_v34 = vpop.f32.mrb[10].mxu1 }
 0xa2f   : > { %v1292_v35 = vsel %vm1291_vm9, %v1281_v32, 0.0  ;;  %v1648_v36 = vpop.f32.mrb[11].mxu1 }
 0xa30   : > { %v1293_v37 = vadd.f32 %v1292_v35, %v2149_v28 }
 0xa32   : > { %1294 = vst.msk [vmem:[%s2078_s20] sm:$0xff] %vm658_vm1, %v1293_v37 }
 0xa33   : > { %1775 = shalt.err (!%p1772_p8)
}
 0xa34   : > { %s1776_s20 = scalar_lea.hbm %s2200_s14, 128  ;;  %s1780_s5 = scalar_lea.hbm %s2327_s18, 256 }
 0xa35   : > { %p1777_p10 = scmp.ne.s32.totalorder %s2200_s14, %s1776_s20  ;;  %p1781_p13 = scmp.lt.u32.totalorder %s2200_s14, %s2327_s18 }
 0xa36   : > { %p1782_p0 = scmp.lt.u32.totalorder %s1780_s5, %s1776_s20  ;;  %p1784_p2 = scmp.lt.u32.totalorder %s1776_s20, %s2200_s14 }
 0xa37   : > { %p1778_p11 = pnand %p1777_p10, %p1988_p3 }
 0xa38   : > { %p1783_p1 = por %p1782_p0, %p1781_p13 }
 0xa39   : > { %p1779_p12 = pneg %p1778_p11 }
 0xa3a   : > { %p1785_p4 = por %p1784_p2, %p1783_p1 }
 0xa3c   : > { %p1786_p5 = pnand %p1785_p4, %p1779_p12 }
 0xa3e   : > { %1789 = shalt.err (!%p1786_p5)
}
 0xa3f   : > { %1649 = dma.vmem_to_hbm [thread:$0]  (%p1988_p3), %s2202_s17, 128, %s2200_s14, %s1296_s13  }
 0xa40 PF: > { %s2329_s0 = sld [smem:[#allocation13_spill]]  ;;  %s2330_s30 = sld [smem:[#allocation6_spill]] }
 0xa46   : > { %p1655_p6 = scmp.ge.s32.totalorder %s2329_s0, 2  ;;  %s1321_s7 = sand.u32 1, %s2330_s30  }
 0xa47   : > { %s1322_s11 = scalar_lea.sflag [#allocation4], %s1321_s7 }
 0xa48   : > { %p1652_p7 = pnand %p1655_p6, %p1998_p9 }
 0xa4a   : > { %1823 = dma.done.wait (!%p1652_p7), %s1322_s11, 128  }
 0xa4b   : > { %1825 = vsyncadd (!%p1652_p7), %s1322_s11, 4294967168  ;;  %s26_s15 = sadd.s32 1, %s2329_s0   ;;  %s2332_s25 = sld [smem:[#allocation7_spill]] }
 0xa4c   : > { %p23_p8 = scmp.ge.s32.totalorder %s26_s15, 6   ;;  %s2333_s26 = sld [smem:[#allocation8_spill]] }
 0xa4d   : > { %s2334_s27 = sld [smem:[#allocation18_spill]]  ;;  %s2335_s28 = sld [smem:[#allocation11_spill]] }
 0xa4e   : > { %s2336_s29 = sld [smem:[#allocation12_spill]]  ;;  %s2337_s30 = sld [smem:[#allocation14_spill]] }
 0xa4f   : > { %s2338_s14 = sld [smem:[#allocation16_spill]]  ;;  %25 = sbr.rel (!%p23_p8) target bundleno = 14 (0xe), region = 147 }
 0xa56   :  { %1327 = vsyncpa [#allocation4], 1 }
 0xa57   :  { %1329 = vsyncpa [#allocation4 + $0x1], 1 }

</bundles_post_ra>
